<compile_context>
chip_gen: v7x
topology: tpu7x:2x2x1
jax: 0.10.0
libtpu: 0.0.40
codegen_flags: <defaults>
</compile_context>

<pallas_src>
import jax
import jax.numpy as jnp
from jax.experimental import pallas as pl
from jax.experimental.pallas import tpu as pltpu

LEAKY_SLOPE = 0.01          # PyTorch nn.LeakyReLU default
BN_EPS = 1e-5
IN_DIM = 57
LATENT_DIM = 48
EXPANDED_DIM = 96
LAYER_DIMS = [(IN_DIM, 52), (52, LATENT_DIM), (LATENT_DIM, 72), (72, EXPANDED_DIM)]
IN_PAD = 64                 # 57 -> 64 (sublane/lane friendly K for layer 1)
H_PAD = 128                 # padded width of every hidden / output layer (lane-dense)


def _round_up(n, m):
    return ((n + m - 1) // m) * m


def _lrelu(v):
    # Identical to LeakyReLU for slope in (0,1); mul+max instead of cmp+mul+select.
    return jnp.maximum(v, LEAKY_SLOPE * v)


# ------------------------------- kernel --------------------------------------

def simple_dense_kernel(x_ref, w1_ref, wslab_ref, b_ref, out_ref):
    """One batch tile of the whole (BN-folded, L2/L3-fused) SimpleDense forward.

    x_ref    : (B_tile, 64)      bf16   zero-padded input features
    w1_ref   : (64, 128)         bf16   layer-1 weight, zero padded
    wslab_ref: (2, 128, 128)     bf16   [0]=folded w2@w3, [1]=w4, zero padded
    b_ref    : (8, 128)          f32    rows 0..2 = b1, b23, b4 (zero padded)
    out_ref  : (B_tile, 128)     bf16   lane-dense output (true cols 0..95)
    """
    x = x_ref[...]            # (B_tile, 64) bf16
    b = b_ref[...]            # (8, 128) f32

    # Linear(57,52)+BN -> LeakyReLU
    h = jnp.dot(x, w1_ref[...], preferred_element_type=jnp.float32) + b[0:1, :]
    h = _lrelu(h)

    # folded [Linear(52,48)+BN ; Linear(48,72)+BN] -> LeakyReLU
    h = jnp.dot(h.astype(jnp.bfloat16), wslab_ref[0],
                preferred_element_type=jnp.float32) + b[1:2, :]
    h = _lrelu(h)

    # Linear(72,96)+BN
    z = jnp.dot(h.astype(jnp.bfloat16), wslab_ref[1],
                preferred_element_type=jnp.float32) + b[2:3, :]

    out_ref[...] = z.astype(jnp.bfloat16)   # full 128-lane unmasked store


# ------------------------------ wrapper ---------------------------------------

def pack_params(ws, bs):
    """Fold L2/L3 (f32) and pack weights + biases into lane-padded slabs."""
    # fold the activation-free pair: h @ w2 + b2 -> @ w3 + b3  ==  h @ w23 + b23
    w23 = ws[1] @ ws[2]                     # (52, 72) f32
    b23 = bs[1] @ ws[2] + bs[2]             # (72,)    f32
    eff_ws = [ws[0], w23, ws[3]]
    eff_bs = [bs[0], b23, bs[3]]

    w1 = jnp.zeros((IN_PAD, H_PAD), jnp.float32)
    w1 = w1.at[:eff_ws[0].shape[0], :eff_ws[0].shape[1]].set(eff_ws[0])

    wslab = jnp.zeros((2, H_PAD, H_PAD), jnp.float32)
    for l in (1, 2):
        wslab = wslab.at[l - 1, :eff_ws[l].shape[0], :eff_ws[l].shape[1]].set(eff_ws[l])

    bias = jnp.zeros((8, H_PAD), jnp.float32)        # sublane-aligned bias slab
    for l in range(3):
        bias = bias.at[l, :eff_bs[l].shape[0]].set(eff_bs[l])

    return w1.astype(jnp.bfloat16), wslab.astype(jnp.bfloat16), bias


def _choose_b_tile(B, b_tile):
    """Tile multiple of 8; for large B cap so the grid has >= 2 steps (v7x)."""
    Bp8 = _round_up(max(B, 1), 8)
    if Bp8 <= b_tile:
        return Bp8                                  # single small tile
    half = _round_up((Bp8 + 1) // 2, 8)
    return max(8, min(b_tile, half))


def simple_dense_forward(x, ws, bs, *, b_tile=1024):
    """x: (B, 57) float32. Returns (B, 96) float32."""
    B = x.shape[0]
    w1, wslab, bias = pack_params(ws, bs)

    bt = _choose_b_tile(B, b_tile)
    Bp = _round_up(B, bt)
    grid = (Bp // bt,)

    # zero-pad batch to a tile multiple and features 57 -> 64, directly in bf16
    xp = jnp.zeros((Bp, IN_PAD), jnp.bfloat16)
    xp = xp.at[:B, :IN_DIM].set(x.astype(jnp.bfloat16))

    flops = 2 * Bp * (IN_PAD * H_PAD + 2 * H_PAD * H_PAD)
    bytes_accessed = (xp.size * 2 + w1.size * 2 + wslab.size * 2
                      + bias.size * 4 + Bp * H_PAD * 2)

    out = pl.pallas_call(
        simple_dense_kernel,
        out_shape=jax.ShapeDtypeStruct((Bp, H_PAD), jnp.bfloat16),
        grid_spec=pltpu.PrefetchScalarGridSpec(
            num_scalar_prefetch=0,
            grid=grid,
            in_specs=[
                pl.BlockSpec((bt, IN_PAD), lambda i: (i, 0)),          # x tile
                pl.BlockSpec((IN_PAD, H_PAD), lambda i: (0, 0)),       # w1 (resident)
                pl.BlockSpec((2, H_PAD, H_PAD), lambda i: (0, 0, 0)),  # w23/w4 slab
                pl.BlockSpec((8, H_PAD), lambda i: (0, 0)),            # bias slab
            ],
            out_specs=pl.BlockSpec((bt, H_PAD), lambda i: (i, 0)),
        ),
        compiler_params=pltpu.CompilerParams(
            dimension_semantics=("parallel",),      # megacore sharding on v7x
            vmem_limit_bytes=32 * 1024 * 1024,      # safe on v5e/v6e/v7x
        ),
        cost_estimate=pl.CostEstimate(
            flops=int(flops), transcendentals=0,
            bytes_accessed=int(bytes_accessed)),
    )(xp, w1, wslab, bias)

    # Slice true columns; cast back to f32 here only because downstream
    # (the reference check) expects f32 — drop if bf16 is acceptable downstream.
    return out[:B, :EXPANDED_DIM].astype(jnp.float32)


# ----------------------- parameter construction (glue) ------------------------

def _linear_init(key, fan_in, fan_out):
    """PyTorch nn.Linear default init: U(-1/sqrt(fan_in), 1/sqrt(fan_in))."""
    kw, kb = jax.random.split(key)
    bound = 1.0 / jnp.sqrt(fan_in)
    w = jax.random.uniform(kw, (fan_in, fan_out), jnp.float32, -bound, bound)
    b = jax.random.uniform(kb, (fan_out,), jnp.float32, -bound, bound)
    return w, b


def _bn_params(key, dim):
    """Synthetic (deterministic) inference-mode BatchNorm1d stats + affine."""
    k1, k2, k3, k4 = jax.random.split(key, 4)
    gamma = jax.random.uniform(k1, (dim,), jnp.float32, 0.5, 1.5)
    beta = 0.1 * jax.random.normal(k2, (dim,), jnp.float32)
    running_mean = 0.1 * jax.random.normal(k3, (dim,), jnp.float32)
    running_var = jax.random.uniform(k4, (dim,), jnp.float32, 0.5, 1.5)
    return gamma, beta, running_mean, running_var


def _fold_bn(w, b, gamma, beta, mean, var):
    """Fold eval-mode BN into the preceding Linear."""
    scale = gamma / jnp.sqrt(var + BN_EPS)      # (out,)
    shift = beta - mean * scale                 # (out,)
    return w * scale[None, :], b * scale + shift


def make_params(key):
    keys = jax.random.split(key, 2 * len(LAYER_DIMS))
    ws, bs = [], []
    for l, (fi, fo) in enumerate(LAYER_DIMS):
        w, b = _linear_init(keys[2 * l], fi, fo)
        w, b = _fold_bn(w, b, *_bn_params(keys[2 * l + 1], fo))
        ws.append(w)
        bs.append(b)
    return ws, bs


def simple_dense_reference(x, ws, bs):
    """Plain-JAX f32 reference (un-fused 4-layer math, BN folded)."""
    h = _lrelu(x @ ws[0] + bs[0])
    h = h @ ws[1] + bs[1]
    h = _lrelu(h @ ws[2] + bs[2])
    return h @ ws[3] + bs[3]


if __name__ == "__main__":
    key = jax.random.PRNGKey(0)
    kx, kp = jax.random.split(key)

    B = 8
    x = jax.random.normal(kx, (B, IN_DIM), jnp.float32)
    ws, bs = make_params(kp)

    z = simple_dense_forward(x, ws, bs)
    z = jax.block_until_ready(z)

    z_ref = simple_dense_reference(x, ws, bs)
    assert z.shape == (B, EXPANDED_DIM), z.shape
    assert jnp.all(jnp.isfinite(z))
    assert jnp.allclose(z, z_ref, atol=5e-2, rtol=5e-2), "kernel output mismatch"

    print("KERNEL_OK")
</pallas_src>

<mosaic_0001>
module attributes {stable_mosaic.version = 11 : i64} {
  func.func @simple_dense_kernel(%arg0: i32, %arg1: memref<8x64xbf16, #tpu.memory_space<vmem>>, %arg2: memref<64x128xbf16, #tpu.memory_space<vmem>>, %arg3: memref<2x128x128xbf16, #tpu.memory_space<vmem>>, %arg4: memref<8x128xf32, #tpu.memory_space<vmem>>, %arg5: memref<8x128xbf16, #tpu.memory_space<vmem>>) attributes {dimension_semantics = [#tpu.dimension_semantics<parallel>], iteration_bounds = array<i64: 1>, scalar_prefetch = 0 : i64, scratch_operands = 0 : i64, tpu.core_type = #tpu.core_type<tc>, window_params = [{transform_indices = @transform_0, window_bounds = array<i64: 8, 64>}, {pipeline_mode = #tpu.pipeline_mode<synchronous>, transform_indices = @transform_1, window_bounds = array<i64: 64, 128>}, {pipeline_mode = #tpu.pipeline_mode<synchronous>, transform_indices = @transform_2, window_bounds = array<i64: 2, 128, 128>}, {pipeline_mode = #tpu.pipeline_mode<synchronous>, transform_indices = @transform_3, window_bounds = array<i64: 8, 128>}, {transform_indices = @transform_4, window_bounds = array<i64: 8, 128>}]} {
    %c0 = arith.constant 0 : index
    %c0_0 = arith.constant 0 : index
    %0 = vector.load %arg1[%c0, %c0_0] : memref<8x64xbf16, #tpu.memory_space<vmem>>, vector<8x64xbf16>
    %c0_1 = arith.constant 0 : index
    %c0_2 = arith.constant 0 : index
    %1 = vector.load %arg4[%c0_1, %c0_2] : memref<8x128xf32, #tpu.memory_space<vmem>>, vector<8x128xf32>
    %c0_3 = arith.constant 0 : index
    %c0_4 = arith.constant 0 : index
    %2 = vector.load %arg2[%c0_3, %c0_4] : memref<64x128xbf16, #tpu.memory_space<vmem>>, vector<64x128xbf16>
    %cst = arith.constant dense<0.000000e+00> : vector<8x128xf32>
    %3 = tpu.matmul %0, %2, %cst {dimension_numbers = #tpu.dot_dimension_numbers<[1], [0], [0], [1], [0, 0, 1, 1], [], []>} : vector<8x64xbf16>, vector<64x128xbf16>, vector<8x128xf32> -> vector<8x128xf32>
    %4 = vector.extract_strided_slice %1 {offsets = [0, 0], sizes = [1, 128], strides = [1, 1]} : vector<8x128xf32> to vector<1x128xf32>
    %5 = vector.broadcast %4 : vector<1x128xf32> to vector<8x128xf32>
    %6 = arith.addf %3, %5 : vector<8x128xf32>
    %cst_5 = arith.constant 0.00999999977 : f32
    %7 = vector.broadcast %cst_5 : f32 to vector<8x128xf32>
    %8 = arith.mulf %7, %6 : vector<8x128xf32>
    %9 = arith.maximumf %6, %8 : vector<8x128xf32>
    %10 = arith.truncf %9 : vector<8x128xf32> to vector<8x128xbf16>
    %c0_6 = arith.constant 0 : index
    %c0_7 = arith.constant 0 : index
    %c0_8 = arith.constant 0 : index
    %11 = vector.load %arg3[%c0_6, %c0_7, %c0_8] : memref<2x128x128xbf16, #tpu.memory_space<vmem>>, vector<1x128x128xbf16>
    %12 = vector.shape_cast %11 : vector<1x128x128xbf16> to vector<128x128xbf16>
    %cst_9 = arith.constant dense<0.000000e+00> : vector<8x128xf32>
    %13 = tpu.matmul %10, %12, %cst_9 {dimension_numbers = #tpu.dot_dimension_numbers<[1], [0], [0], [1], [0, 0, 1, 1], [], []>} : vector<8x128xbf16>, vector<128x128xbf16>, vector<8x128xf32> -> vector<8x128xf32>
    %14 = vector.extract_strided_slice %1 {offsets = [1, 0], sizes = [1, 128], strides = [1, 1]} : vector<8x128xf32> to vector<1x128xf32>
    %15 = vector.broadcast %14 : vector<1x128xf32> to vector<8x128xf32>
    %16 = arith.addf %13, %15 : vector<8x128xf32>
    %cst_10 = arith.constant 0.00999999977 : f32
    %17 = vector.broadcast %cst_10 : f32 to vector<8x128xf32>
    %18 = arith.mulf %17, %16 : vector<8x128xf32>
    %19 = arith.maximumf %16, %18 : vector<8x128xf32>
    %20 = arith.truncf %19 : vector<8x128xf32> to vector<8x128xbf16>
    %c1 = arith.constant 1 : index
    %c0_11 = arith.constant 0 : index
    %c0_12 = arith.constant 0 : index
    %21 = vector.load %arg3[%c1, %c0_11, %c0_12] : memref<2x128x128xbf16, #tpu.memory_space<vmem>>, vector<1x128x128xbf16>
    %22 = vector.shape_cast %21 : vector<1x128x128xbf16> to vector<128x128xbf16>
    %cst_13 = arith.constant dense<0.000000e+00> : vector<8x128xf32>
    %23 = tpu.matmul %20, %22, %cst_13 {dimension_numbers = #tpu.dot_dimension_numbers<[1], [0], [0], [1], [0, 0, 1, 1], [], []>} : vector<8x128xbf16>, vector<128x128xbf16>, vector<8x128xf32> -> vector<8x128xf32>
    %24 = vector.extract_strided_slice %1 {offsets = [2, 0], sizes = [1, 128], strides = [1, 1]} : vector<8x128xf32> to vector<1x128xf32>
    %25 = vector.broadcast %24 : vector<1x128xf32> to vector<8x128xf32>
    %26 = arith.addf %23, %25 : vector<8x128xf32>
    %27 = arith.truncf %26 : vector<8x128xf32> to vector<8x128xbf16>
    %c0_14 = arith.constant 0 : index
    %c0_15 = arith.constant 0 : index
    %28 = vector.load %arg5[%c0_14, %c0_15] : memref<8x128xbf16, #tpu.memory_space<vmem>>, vector<8x128xbf16>
    tpu.vector_store %arg5[%c0_14, %c0_15], %27 {strides = array<i32>} : memref<8x128xbf16, #tpu.memory_space<vmem>>, vector<8x128xbf16>,
    return
  }
  func.func @transform_0(%arg0: i32) -> (i32, i32) {
    %c0_i32 = arith.constant 0 : i32
    %c0_i32_0 = arith.constant 0 : i32
    return %arg0, %c0_i32 : i32, i32
  }
  func.func @transform_1(%arg0: i32) -> (i32, i32) {
    %c0_i32 = arith.constant 0 : i32
    %c0_i32_0 = arith.constant 0 : i32
    %c0_i32_1 = arith.constant 0 : i32
    return %c0_i32, %c0_i32_0 : i32, i32
  }
  func.func @transform_2(%arg0: i32) -> (i32, i32, i32) {
    %c0_i32 = arith.constant 0 : i32
    %c0_i32_0 = arith.constant 0 : i32
    %c0_i32_1 = arith.constant 0 : i32
    %c0_i32_2 = arith.constant 0 : i32
    return %c0_i32, %c0_i32_0, %c0_i32_1 : i32, i32, i32
  }
  func.func @transform_3(%arg0: i32) -> (i32, i32) {
    %c0_i32 = arith.constant 0 : i32
    %c0_i32_0 = arith.constant 0 : i32
    %c0_i32_1 = arith.constant 0 : i32
    return %c0_i32, %c0_i32_0 : i32, i32
  }
  func.func @transform_4(%arg0: i32) -> (i32, i32) {
    %c0_i32 = arith.constant 0 : i32
    %c0_i32_0 = arith.constant 0 : i32
    return %arg0, %c0_i32 : i32, i32
  }
}

</mosaic_0001>

<bundles_post_ra>
// kernel: tpu_custom_call.1
= control target key start
LH: loop header
LB: loop body
LE: loop exit
PB: predicated region body
PF: predicated region fallthrough
CT: control target
= control target key end

     0   :  { %9 = vsyncpa [#allocation3], 0  ;;  %s715_s0 = inlined_call_operand.hbm [shape: bf16[8,64], index: 0, kind: input, shape index: {}]   ;;  %s716_s1 = inlined_call_operand.hbm [shape: bf16[64,128], index: 1, kind: input, shape index: {}]   ;;  %s717_s2 = inlined_call_operand.hbm [shape: bf16[2,128,128], index: 2, kind: input, shape index: {}]   ;;  %s718_s3 = inlined_call_operand.vmem [shape: f32[8,128], index: 3, kind: input, shape index: {}]   ;;  %s719_s4 = inlined_call_operand.hbm [shape: bf16[8,128], index: 4, kind: output, shape index: {}]  }
   0x1   :  { %10 = vsyncpa [#allocation6], 0 }
   0x2   :  { %11 = vsyncpa [#allocation4], 0  ;;  %s599_s15 = smov [#allocation5]   ;;  %s505_s19 = scalar_lea.hbm %s716_s1, 512 }
   0x3   :  { %s27_s16 = sshll.u32 %s599_s15, 4  ;;  %p506_p0 = scmp.ne.s32.totalorder %s716_s1, %s505_s19  ;;  %s28_s16 = int_to_ptr.vmem [resolvable:$true] %s27_s16 }
   0x4   :  { %p509_p1 = scmp.lt.u32.totalorder %s505_s19, %s716_s1 }
   0x6   :  { %p511_p2 = pnand %p509_p1, %p506_p0 }
   0x8   :  { %514 = shalt.err (!%p511_p2)
}
   0x9   :  { %s515_s24 = scalar_lea.vmem %s28_s16, 512  ;;  %p520_p4 = scmp.lt.s32.totalorder %s28_s16, %s28_s16 }
   0xa   :  { %p516_p3 = scmp.ne.s32.totalorder %s28_s16, %s515_s24  ;;  %p521_p5 = scmp.lt.s32.totalorder %s515_s24, %s515_s24 }
   0xc   :  { %p522_p6 = por %p521_p5, %p520_p4 }
   0xe   :  { %p523_p7 = pnand %p522_p6, %p516_p3 }
  0x10   :  { %526 = shalt.err (!%p523_p7)
}
  0x11   :  { %s600_s25 = smov 64   ;;  %s601_s26 = smov 4  }
  0x12   :  { %33 = dma.hbm_to_vmem [thread:$0]  %s716_s1, 512, %s28_s16, [#allocation6], %s600_s25, %s600_s25, %s601_s26  }
  0x13   :  { %s602_s29 = smov [#allocation2]   ;;  %s603_s5 = smov [#allocation7]  }
  0x14   :  { %s18_s30 = sshll.u32 %s602_s29, 4  ;;  %s39_s6 = sshll.u32 %s603_s5, 4  ;;  %s19_s30 = int_to_ptr.vmem [resolvable:$true] %s18_s30  ;;  %s40_s6 = int_to_ptr.vmem [resolvable:$true] %s39_s6 }
  0x15   :  { %s527_s9 = scalar_lea.hbm %s715_s0, 64 }
  0x16   :  { %p528_p8 = scmp.ne.s32.totalorder %s715_s0, %s527_s9  ;;  %p531_p9 = scmp.lt.u32.totalorder %s527_s9, %s715_s0 }
  0x18   :  { %p533_p10 = pnand %p531_p9, %p528_p8 }
  0x1a   :  { %536 = shalt.err (!%p533_p10)
}
  0x1b   :  { %s537_s1 = scalar_lea.vmem %s19_s30, 64  ;;  %p542_p12 = scmp.lt.s32.totalorder %s19_s30, %s19_s30 }
  0x1c   :  { %p538_p11 = scmp.ne.s32.totalorder %s19_s30, %s537_s1  ;;  %p543_p13 = scmp.lt.s32.totalorder %s537_s1, %s537_s1 }
  0x1e   :  { %p544_p0 = por %p543_p13, %p542_p12 }
  0x20   :  { %p545_p1 = pnand %p544_p0, %p538_p11 }
  0x22   :  { %548 = shalt.err (!%p545_p1)
}
  0x23   :  { %21 = dma.hbm_to_vmem [thread:$0]  %s715_s0, 64, %s19_s30, [#allocation3]  }
  0x24   :  { %s549_s18 = scalar_lea.hbm %s717_s2, 2048 }
  0x25   :  { %p550_p2 = scmp.ne.s32.totalorder %s717_s2, %s549_s18  ;;  %p553_p3 = scmp.lt.u32.totalorder %s549_s18, %s717_s2 }
  0x27   :  { %p555_p4 = pnand %p553_p3, %p550_p2 }
  0x29   :  { %558 = shalt.err (!%p555_p4)
}
  0x2a   :  { %s559_s23 = scalar_lea.vmem %s40_s6, 2048  ;;  %p564_p6 = scmp.lt.s32.totalorder %s40_s6, %s40_s6 }
  0x2b   :  { %p560_p5 = scmp.ne.s32.totalorder %s40_s6, %s559_s23  ;;  %p565_p7 = scmp.lt.s32.totalorder %s559_s23, %s559_s23 }
  0x2d   :  { %p566_p8 = por %p565_p7, %p564_p6 }
  0x2f   :  { %p567_p9 = pnand %p566_p8, %p560_p5 }
  0x31   :  { %570 = shalt.err (!%p567_p9)
}
  0x32   :  { %45 = dma.hbm_to_vmem [thread:$0]  %s717_s2, 2048, %s40_s6, [#allocation6], %s600_s25, %s600_s25, %s601_s26  }
  0x33   :  { %593 = dma.done.wait [#allocation3], 64  }
  0x34   :  { %594 = vsyncadd [#allocation3], 4294967232 }
  0x35   :  { %595 = dma.done.wait [#allocation6], 2560  }
  0x36   :  { %596 = vsyncadd [#allocation6], 4294964736  ;;  %v604_v0 = vmov 0.0   ;;  %vm605_vm0 = vmmov 0   ;;  %v485_v1 = vld [vmem:[#allocation5] sm:$0xff]   ;;  %v486_v2 = vld [vmem:[#allocation5 + $0x8] sm:$0xff]   ;;  %v68_v20 = vlaneseq }
  0x37   :  { %425 = vmatprep.subr.bf16.mxu0 %v604_v0  ;;  %433 = vmatprep.mubr.msk.bf16.mxu0 %vm605_vm0, %v604_v0  ;;  %v489_v3 = vld [vmem:[#allocation7] sm:$0xff]   ;;  %v487_v4 = vld [vmem:[#allocation5 + $0x10] sm:$0xff]   ;;  %v490_v5 = vld [vmem:[#allocation7 + $0x8] sm:$0xff]   ;;  %vm96_vm1 = vcmask 523264  }
  0x38   :  { %437 = vmatprep.subr.bf16.mxu1 %v604_v0  ;;  %453 = vmatprep.mubr.msk.bf16.mxu1 %vm605_vm0, %v604_v0  ;;  %v488_v6 = vld [vmem:[#allocation5 + $0x18] sm:$0xff]   ;;  %v491_v7 = vld [vmem:[#allocation7 + $0x10] sm:$0xff]   ;;  %v493_v10 = vld [vmem:[#allocation7 + $0x20] sm:$0xff]   ;;  %v69_v21 = vshrl.u32 %v68_v20, 7 }
  0x39   :  { %426 = vmatpush3.bf16.msra.mxu0 %v485_v1  ;;  %438 = vmatpush3.bf16.msra.mxu1 %v489_v3  ;;  %v58_v8 = vld [vmem:[#allocation2] sm:$0xf]  ;;  %v494_v11 = vld [vmem:[#allocation7 + $0x28] sm:$0xff]   ;;  %v495_v12 = vld [vmem:[#allocation7 + $0x30] sm:$0xff]  }
  0x3a   :  { %427 = vmatprep.subr.bf16.mxu0 %v604_v0  ;;  %439 = vmatprep.subr.bf16.mxu1 %v604_v0  ;;  %v492_v9 = vld [vmem:[#allocation7 + $0x18] sm:$0xff]   ;;  %v497_v14 = vld [vmem:[#allocation7 + $0x40] sm:$0xff]   ;;  %v498_v15 = vld [vmem:[#allocation7 + $0x48] sm:$0xff]   ;;  %v70_v22 = vsub.s32 0, %v69_v21  ;;  %v161_v35 = vsub.s32 1, %v69_v21  ;;  %v273_v45 = vsub.s32 2, %v69_v21 }
  0x3b   :  { %v496_v13 = vld [vmem:[#allocation7 + $0x38] sm:$0xff]   ;;  %v499_v16 = vld [vmem:[#allocation7 + $0x50] sm:$0xff]   ;;  %v501_v18 = vld [vmem:[#allocation7 + $0x60] sm:$0xff]  }
  0x3c   :  { %v500_v17 = vld [vmem:[#allocation7 + $0x58] sm:$0xff]   ;;  %v502_v19 = vld [vmem:[#allocation7 + $0x68] sm:$0xff]   ;;  %v503_v33 = vld [vmem:[#allocation7 + $0x70] sm:$0xff]  }
  0x3d   :  { %428 = vmatpush3.bf16.msra.mxu0 %v486_v2  ;;  %440 = vmatpush3.bf16.msra.mxu1 %v490_v5  ;;  %v59_v23 = vld [vmem:[%s718_s3] sm:$0xff]  ;;  %s606_s3 = smov [#allocation8]  }
  0x3e   :  { %429 = vmatprep.subr.bf16.mxu0 %v604_v0  ;;  %441 = vmatprep.subr.bf16.mxu1 %v604_v0  ;;  %v71_v24 = vrot.slane %v59_v23, %v70_v22  ;;  %v504_v34 = vld [vmem:[#allocation7 + $0x78] sm:$0xff]   ;;  %v162_v36 = vrot.slane %v59_v23, %v161_v35  ;;  %v274_v46 = vrot.slane %v59_v23, %v273_v45  ;;  %s371_s26 = sshll.u32 %s606_s3, 4  ;;  %s372_s26 = int_to_ptr.vmem [resolvable:$true] %s371_s26 }
  0x3f   :  { %s571_s27 = scalar_lea.vmem %s372_s26, 64  ;;  %p576_p11 = scmp.lt.s32.totalorder %s372_s26, %s372_s26 }
  0x40   :  { %p572_p10 = scmp.ne.s32.totalorder %s372_s26, %s571_s27  ;;  %p577_p12 = scmp.lt.s32.totalorder %s571_s27, %s571_s27 }
  0x41   :  { %430 = vmatpush3.bf16.msra.mxu0 %v487_v4  ;;  %442 = vmatpush3.bf16.msra.mxu1 %v491_v7 }
  0x42   :  { %431 = vmatprep.subr.bf16.mxu0 %v604_v0  ;;  %443 = vmatprep.subr.bf16.mxu1 %v604_v0  ;;  %p578_p13 = por %p577_p12, %p576_p11 }
  0x44   :  { %p579_p0 = pnand %p578_p13, %p572_p10 }
  0x45   :  { %432 = vmatpush3.bf16.msra.mxu0 %v488_v6  ;;  %444 = vmatpush3.bf16.msra.mxu1 %v492_v9 }
  0x46   :  { %457 = vmatprep.subr.bf16.mxu0 %v604_v0  ;;  %445 = vmatprep.subr.bf16.mxu1 %v604_v0 }
  0x48   :  { %434 = vmatmul.mubr.msk.bf16.vlgmr.msra.gmra.mrb[0].mxu0 %vm96_vm1, %v58_v8 }
  0x49   :  { %473 = vmatprep.mubr.msk.bf16.mxu0 %vm605_vm0, %v604_v0  ;;  %446 = vmatpush3.bf16.msra.mxu1 %v493_v10 }
  0x4a   :  { %447 = vmatprep.subr.bf16.mxu1 %v604_v0  ;;  %458 = vmatpush3.bf16.msra.mxu0 %v497_v14 }
  0x4b   :  { %459 = vmatprep.subr.bf16.mxu0 %v604_v0 }
  0x4d   :  { %448 = vmatpush3.bf16.msra.mxu1 %v494_v11 }
  0x4e   :  { %449 = vmatprep.subr.bf16.mxu1 %v604_v0  ;;  %460 = vmatpush3.bf16.msra.mxu0 %v498_v15 }
  0x4f   :  { %461 = vmatprep.subr.bf16.mxu0 %v604_v0 }
  0x51   :  { %450 = vmatpush3.bf16.msra.mxu1 %v495_v12 }
  0x52   :  { %451 = vmatprep.subr.bf16.mxu1 %v604_v0  ;;  %462 = vmatpush3.bf16.msra.mxu0 %v499_v16 }
  0x53   :  { %463 = vmatprep.subr.bf16.mxu0 %v604_v0 }
  0x55   :  { %452 = vmatpush3.bf16.msra.mxu1 %v496_v13 }
  0x56   :  { %464 = vmatpush3.bf16.msra.mxu0 %v500_v17 }
  0x57   :  { %465 = vmatprep.subr.bf16.mxu0 %v604_v0 }
  0x5a   :  { %466 = vmatpush3.bf16.msra.mxu0 %v501_v18 }
  0x5b   :  { %467 = vmatprep.subr.bf16.mxu0 %v604_v0 }
  0x5e   :  { %468 = vmatpush3.bf16.msra.mxu0 %v502_v19 }
  0x5f   :  { %469 = vmatprep.subr.bf16.mxu0 %v604_v0 }
  0x62   :  { %470 = vmatpush3.bf16.msra.mxu0 %v503_v33 }
  0x63   :  { %471 = vmatprep.subr.bf16.mxu0 %v604_v0 }
  0x66   :  { %472 = vmatpush3.bf16.msra.mxu0 %v504_v34 }
 0x11b   :  { %v134_v25 = vpop.f32.mrb[0].mxu0 }
 0x11c   :  { %v135_v26 = vadd.f32 %v134_v25, %v71_v24  ;;  %v435_v27 = vpop.f32.mrb[1].mxu0 }
 0x11d   :  { %v137_v28 = vpop.f32.mrb[2].mxu0 }
 0x11e   :  { %v140_v29 = vmul.f32 0.01, %v135_v26  ;;  %v436_v30 = vpop.f32.mrb[3].mxu0 }
 0x120   :  { %v141_v31 = vmax.f32 %v135_v26, %v140_v29 }
 0x122   :  { %v142_v32 = vpack.c.bf16 %v141_v31, %v141_v31 }
 0x124   :  { %454 = vmatmul.mubr.bf16.vlgmr.msra.gmra.mrb[0].mxu1 %v142_v32 }
 0x1f7   :  { %v245_v37 = vpop.f32.mrb[0].mxu1 }
 0x1f8   :  { %v246_v38 = vadd.f32 %v245_v37, %v162_v36  ;;  %v455_v39 = vpop.f32.mrb[1].mxu1 }
 0x1f9   :  { %v248_v40 = vpop.f32.mrb[2].mxu1 }
 0x1fa   :  { %v251_v41 = vmul.f32 0.01, %v246_v38  ;;  %v456_v42 = vpop.f32.mrb[3].mxu1 }
 0x1fc   :  { %v252_v43 = vmax.f32 %v246_v38, %v251_v41 }
 0x1fe   :  { %v253_v44 = vpack.c.bf16 %v252_v43, %v252_v43 }
 0x200   :  { %474 = vmatmul.mubr.bf16.vlgmr.msra.gmra.mrb[4].mxu0 %v253_v44 }
 0x2d3   :  { %v357_v47 = vpop.f32.mrb[4].mxu0 }
 0x2d4   :  { %v358_v48 = vadd.f32 %v357_v47, %v274_v46  ;;  %v475_v49 = vpop.f32.mrb[5].mxu0 }
 0x2d5   :  { %v360_v50 = vpop.f32.mrb[6].mxu0 }
 0x2d6   :  { %v363_v51 = vpack.c.bf16 %v358_v48, %v358_v48  ;;  %v476_v52 = vpop.f32.mrb[7].mxu0 }
 0x2d8   :  { %364 = vst [vmem:[#allocation8] sm:$0xf] %v363_v51 }
 0x2d9   :  { %582 = shalt.err (!%p579_p0)
}
 0x2da   :  { %s583_s30 = scalar_lea.hbm %s719_s4, 64 }
 0x2db   :  { %p584_p1 = scmp.ne.s32.totalorder %s719_s4, %s583_s30  ;;  %p587_p2 = scmp.lt.u32.totalorder %s583_s30, %s719_s4 }
 0x2dd   :  { %p589_p3 = pnand %p587_p2, %p584_p1 }
 0x2df   :  { %592 = shalt.err (!%p589_p3)
}
 0x2e0   :  { %374 = dma.vmem_to_hbm [thread:$0]  %s372_s26, 64, %s719_s4, [#allocation4]  }
 0x2e1   :  { %597 = dma.done.wait [#allocation4], 64  }
 0x2e2   :  { %598 = vsyncadd [#allocation4], 4294967232 }
 0x2e3   :  { %378 = vsyncpa [#allocation3], 1 }
 0x2e4   :  { %379 = vsyncpa [#allocation6], 1 }
 0x2e5   :  { %380 = vsyncpa [#allocation4], 1 }

</bundles_post_ra>
